<compile_context>
chip_gen: v6e
topology: v6e:2x2x1
jax: 0.10.0
libtpu: 0.0.40
codegen_flags: <defaults>
</compile_context>

<pallas_src>
import math

import jax
import jax.numpy as jnp
from jax.experimental import pallas as pl
from jax.experimental.pallas import tpu as pltpu


# -----------------------------------------------------------------------------
# Pallas kernel 1: project last_hidden ONCE through both halves of the "cat"
# combine matrix with a single fused weight:
#   [A | Bm] = X @ [Wa^T | Wb^T],   A += combine_bias
# -----------------------------------------------------------------------------
def _project_kernel(x_ref, wabT_ref, bc_ref, a_ref, b_ref):
    x = x_ref[0]                                                    # (S, H) bf16
    ab = jnp.dot(x, wabT_ref[...], preferred_element_type=jnp.float32)  # (S, 2H) f32
    H = a_ref.shape[-1]
    a_ref[0] = (ab[:, :H] + bc_ref[...]).astype(a_ref.dtype)        # A  (+bias once)
    b_ref[0] = ab[:, H:].astype(b_ref.dtype)                        # Bm


# -----------------------------------------------------------------------------
# Pallas kernel 2: fused handshaking combine (+tanh, bf16) and ALL heads on a
# (ti x tj) tile of the (i, j) pair grid, skipping tiles fully below the
# diagonal (those pairs are never extracted).
#   shaking[i, j] = tanh(A[i] + Bm[j])            (bf16 add + tanh)
#   logits[i, j]  = shaking[i, j] @ Wheads^T + b  (f32 acc, bf16 store)
# -----------------------------------------------------------------------------
def _handshake_heads_kernel(a_ref, b_ref, whT_ref, bh_ref, out_ref):
    jt = pl.program_id(1)                 # j-tile index (outer)
    it = pl.program_id(2)                 # i-tile index (inner; Bm tile resident)
    ti = a_ref.shape[1]
    tj = b_ref.shape[1]

    # Triangular skip: tile contains some pair with j >= i iff max_j >= min_i.
    # Skipped tiles leave stale output (never read by the wrapper).
    @pl.when(jt * tj + tj > it * ti)
    def _():
        a = a_ref[0]                                                # (ti, H) bf16
        b = b_ref[0]                                                # (tj, H) bf16
        # bf16 add + tanh (bf16 EUP/VPU path on v6e/v7x; upcast handled by
        # Mosaic on v5e). MXU takes bf16 operands, accumulates in f32.
        sh = jnp.tanh(a[:, None, :] + b[None, :, :])                # (ti, tj, H) bf16
        logits = jnp.dot(sh.reshape(ti * tj, sh.shape[-1]), whT_ref[...],
                         preferred_element_type=jnp.float32) + bh_ref[...]
        out_ref[0] = logits.reshape(ti, tj, -1).astype(out_ref.dtype)


def _round_up(x, m):
    return ((x + m - 1) // m) * m


def tplinker_heads_pallas(last_hidden, combine_w, combine_b,
                          w_headsT_pad, b_heads_pad, *, ti=16, tj=128):
    """Returns dense fused logits of shape (B, Sp, Sq, Kp), bfloat16.

    last_hidden : (B, S, H) f32 encoder output
    combine_w   : (H, 2H) f32   combine_b : (H,) f32
    w_headsT_pad: (H, Kp) f32 (K real columns + zero padding, Kp % 128 == 0)
    b_heads_pad : (Kp,)  f32
    """
    B, S, H = last_hidden.shape
    Kp = w_headsT_pad.shape[1]

    # adapt tile sizes to short sequences; keep sublane-friendly multiples of 8
    ti = min(ti, _round_up(S, 8))
    tj = min(tj, _round_up(S, 8))
    Sp = _round_up(S, ti)
    Sq = _round_up(S, tj)

    # bf16 at the kernel boundary (halves DMA bytes, doubles MXU throughput);
    # f32 accumulation inside the kernels keeps logits numerically safe.
    xb = last_hidden.astype(jnp.bfloat16)
    wabT = jnp.concatenate([combine_w[:, :H].T, combine_w[:, H:].T],
                           axis=1).astype(jnp.bfloat16)             # (H, 2H)
    bc = combine_b.reshape(1, H).astype(jnp.float32)

    # ---- kernel 1: projection, once per token ------------------------------
    A, Bm = pl.pallas_call(
        _project_kernel,
        out_shape=(jax.ShapeDtypeStruct((B, S, H), jnp.bfloat16),
                   jax.ShapeDtypeStruct((B, S, H), jnp.bfloat16)),
        grid_spec=pltpu.PrefetchScalarGridSpec(
            num_scalar_prefetch=0,
            grid=(B,),
            in_specs=[
                pl.BlockSpec((1, S, H), lambda b: (b, 0, 0)),       # X rows of batch b
                pl.BlockSpec((H, 2 * H), lambda b: (0, 0)),         # fused [Wa^T|Wb^T]
                pl.BlockSpec((1, H), lambda b: (0, 0)),             # combine bias
            ],
            out_specs=(pl.BlockSpec((1, S, H), lambda b: (b, 0, 0)),
                       pl.BlockSpec((1, S, H), lambda b: (b, 0, 0))),
        ),
        compiler_params=pltpu.CompilerParams(
            dimension_semantics=("parallel",),
            vmem_limit_bytes=32 * 1024 * 1024),
    )(xb, wabT, bc)

    # pad pair axes so they tile evenly (padded rows/cols never extracted)
    if Sp != S:
        A = jnp.pad(A, ((0, 0), (0, Sp - S), (0, 0)))
    if Sq != S:
        Bm = jnp.pad(Bm, ((0, 0), (0, Sq - S), (0, 0)))

    whb = w_headsT_pad.astype(jnp.bfloat16)                         # (H, Kp)
    bh2 = b_heads_pad.reshape(1, Kp).astype(jnp.float32)

    # ---- kernel 2: fused combine + tanh + all heads, triangular tiles -------
    dense = pl.pallas_call(
        _handshake_heads_kernel,
        out_shape=jax.ShapeDtypeStruct((B, Sp, Sq, Kp), jnp.bfloat16),
        grid_spec=pltpu.PrefetchScalarGridSpec(
            num_scalar_prefetch=0,
            # i-tiles innermost: the (tj, H) Bm tile stays VMEM-resident while
            # the small (ti, H) A tiles stream.
            grid=(B, Sq // tj, Sp // ti),
            in_specs=[
                pl.BlockSpec((1, ti, H), lambda b, jt, it: (b, it, 0)),   # A tile
                pl.BlockSpec((1, tj, H), lambda b, jt, it: (b, jt, 0)),   # Bm tile
                pl.BlockSpec((H, Kp), lambda b, jt, it: (0, 0)),          # heads W^T
                pl.BlockSpec((1, Kp), lambda b, jt, it: (0, 0)),          # heads bias
            ],
            out_specs=pl.BlockSpec((1, ti, tj, Kp),
                                   lambda b, jt, it: (b, it, jt, 0)),
        ),
        compiler_params=pltpu.CompilerParams(
            dimension_semantics=("parallel", "parallel", "parallel"),
            vmem_limit_bytes=32 * 1024 * 1024),
    )(A, Bm, whb, bh2)

    return dense


# -----------------------------------------------------------------------------
# Minimal deterministic BERT-style encoder (plain-JAX glue, stands in for the
# `encoder` argument of TPLinkerBert.__init__)
# -----------------------------------------------------------------------------
def _layer_norm(x, g, b, eps=1e-12):
    mu = jnp.mean(x, axis=-1, keepdims=True)
    var = jnp.mean((x - mu) ** 2, axis=-1, keepdims=True)
    return (x - mu) * jax.lax.rsqrt(var + eps) * g + b


def init_encoder_params(key, vocab, max_pos, hidden):
    ks = jax.random.split(key, 12)
    s = 0.02
    return {
        "word_emb": s * jax.random.normal(ks[0], (vocab, hidden), jnp.float32),
        "pos_emb":  s * jax.random.normal(ks[1], (max_pos, hidden), jnp.float32),
        "type_emb": s * jax.random.normal(ks[2], (2, hidden), jnp.float32),
        "ln0_g": jnp.ones((hidden,), jnp.float32),
        "ln0_b": jnp.zeros((hidden,), jnp.float32),
        "wq": s * jax.random.normal(ks[3], (hidden, hidden), jnp.float32),
        "wk": s * jax.random.normal(ks[4], (hidden, hidden), jnp.float32),
        "wv": s * jax.random.normal(ks[5], (hidden, hidden), jnp.float32),
        "wo": s * jax.random.normal(ks[6], (hidden, hidden), jnp.float32),
        "ln1_g": jnp.ones((hidden,), jnp.float32),
        "ln1_b": jnp.zeros((hidden,), jnp.float32),
        "w_ff1": s * jax.random.normal(ks[7], (hidden, 4 * hidden), jnp.float32),
        "b_ff1": jnp.zeros((4 * hidden,), jnp.float32),
        "w_ff2": s * jax.random.normal(ks[8], (4 * hidden, hidden), jnp.float32),
        "b_ff2": jnp.zeros((hidden,), jnp.float32),
        "ln2_g": jnp.ones((hidden,), jnp.float32),
        "ln2_b": jnp.zeros((hidden,), jnp.float32),
    }


def encoder_forward(p, input_ids, attention_mask, token_type_ids):
    B, S = input_ids.shape
    H = p["word_emb"].shape[1]
    x = (p["word_emb"][input_ids]
         + p["pos_emb"][None, :S, :]
         + p["type_emb"][token_type_ids])
    x = _layer_norm(x, p["ln0_g"], p["ln0_b"])
    q = x @ p["wq"]; k = x @ p["wk"]; v = x @ p["wv"]
    scores = jnp.einsum("bqh,bkh->bqk", q, k) / math.sqrt(H)
    scores = scores + (1.0 - attention_mask.astype(jnp.float32))[:, None, :] * -1e9
    attn = jax.nn.softmax(scores, axis=-1)
    a = jnp.einsum("bqk,bkh->bqh", attn, v) @ p["wo"]
    x = _layer_norm(x + a, p["ln1_g"], p["ln1_b"])
    h = jax.nn.gelu(x @ p["w_ff1"] + p["b_ff1"])
    h = h @ p["w_ff2"] + p["b_ff2"]
    x = _layer_norm(x + h, p["ln2_g"], p["ln2_b"])
    return x  # (B, S, H) last_hidden_state


# -----------------------------------------------------------------------------
# TPLinkerBert parameters + forward
# -----------------------------------------------------------------------------
def init_tplinker_params(key, hidden, rel_size):
    ks = jax.random.split(key, 8)
    lim_c = 1.0 / math.sqrt(2 * hidden)
    lim_h = 1.0 / math.sqrt(hidden)
    return {
        # HandshakingKernel "cat": Linear(2H -> H)
        "combine_w": jax.random.uniform(ks[0], (hidden, 2 * hidden),
                                        jnp.float32, -lim_c, lim_c),
        "combine_b": jax.random.uniform(ks[1], (hidden,), jnp.float32, -lim_c, lim_c),
        # ent_fc: Linear(H -> 2)
        "ent_w": jax.random.uniform(ks[2], (2, hidden), jnp.float32, -lim_h, lim_h),
        "ent_b": jax.random.uniform(ks[3], (2,), jnp.float32, -lim_h, lim_h),
        # head/tail rel fcs: rel_size x Linear(H -> 3)
        "head_rel_w": jax.random.uniform(ks[4], (rel_size, 3, hidden),
                                         jnp.float32, -lim_h, lim_h),
        "head_rel_b": jax.random.uniform(ks[5], (rel_size, 3),
                                         jnp.float32, -lim_h, lim_h),
        "tail_rel_w": jax.random.uniform(ks[6], (rel_size, 3, hidden),
                                         jnp.float32, -lim_h, lim_h),
        "tail_rel_b": jax.random.uniform(ks[7], (rel_size, 3),
                                         jnp.float32, -lim_h, lim_h),
    }


def _pair_indices(S):
    # pair order: i ascending, j = i..S-1 (matches HandshakingKernel "cat")
    i_idx = jnp.concatenate([jnp.full((S - i,), i, jnp.int32) for i in range(S)])
    j_idx = jnp.concatenate([jnp.arange(i, S, dtype=jnp.int32) for i in range(S)])
    return i_idx, j_idx


def _pack_heads(tp_params, H, R):
    # fused heads columns: [ ent(2) | head_rel r-major (3R) | tail_rel (3R) | 0-pad ]
    K = 2 + 6 * R
    Kp = ((K + 127) // 128) * 128                      # lane-dense output stores
    w_heads = jnp.concatenate(
        [tp_params["ent_w"],
         tp_params["head_rel_w"].reshape(R * 3, H),
         tp_params["tail_rel_w"].reshape(R * 3, H)], axis=0)        # (K, H)
    b_heads = jnp.concatenate(
        [tp_params["ent_b"],
         tp_params["head_rel_b"].reshape(R * 3),
         tp_params["tail_rel_b"].reshape(R * 3)], axis=0)           # (K,)
    w_headsT_pad = jnp.zeros((H, Kp), jnp.float32).at[:, :K].set(w_heads.T)
    b_heads_pad = jnp.zeros((Kp,), jnp.float32).at[:K].set(b_heads)
    return w_headsT_pad, b_heads_pad, K


def tplinker_bert_forward(enc_params, tp_params, rel_size,
                          input_ids, attention_mask, token_type_ids):
    B, S = input_ids.shape
    last_hidden = encoder_forward(enc_params, input_ids, attention_mask,
                                  token_type_ids)                   # (B, S, H)
    H = last_hidden.shape[-1]
    R = rel_size

    w_headsT_pad, b_heads_pad, K = _pack_heads(tp_params, H, R)

    # dense fused logits (B, Sp, Sq, Kp), bf16, from the two Pallas kernels
    dense = tplinker_heads_pallas(last_hidden,
                                  tp_params["combine_w"], tp_params["combine_b"],
                                  w_headsT_pad, b_heads_pad, ti=16, tj=128)

    # extract upper-triangular pair rows from the small K-wide logits; upcast
    # the K real columns back to f32
    i_idx, j_idx = _pair_indices(S)
    L = int(i_idx.shape[0])                                         # S*(S+1)//2
    pair_logits = dense[:, i_idx, j_idx, :K].astype(jnp.float32)    # (B, L, K)

    ent_out = pair_logits[:, :, :2]                                 # (B, L, 2)
    head_rel_out = pair_logits[:, :, 2:2 + 3 * R].reshape(B, L, R, 3)
    head_rel_out = jnp.transpose(head_rel_out, (0, 2, 1, 3))        # (B, R, L, 3)
    tail_rel_out = pair_logits[:, :, 2 + 3 * R:K].reshape(B, L, R, 3)
    tail_rel_out = jnp.transpose(tail_rel_out, (0, 2, 1, 3))        # (B, R, L, 3)
    return ent_out, head_rel_out, tail_rel_out


# -----------------------------------------------------------------------------
# pure-JAX references for the self-check
# -----------------------------------------------------------------------------
def reference_pair_logits(last_hidden, tp_params, R, i_idx, j_idx, *, mirror_bf16):
    B, S, H = last_hidden.shape
    cw, cb = tp_params["combine_w"], tp_params["combine_b"]
    waT, wbT = cw[:, :H].T, cw[:, H:].T
    w_heads = jnp.concatenate(
        [tp_params["ent_w"],
         tp_params["head_rel_w"].reshape(R * 3, H),
         tp_params["tail_rel_w"].reshape(R * 3, H)], axis=0)
    b_heads = jnp.concatenate(
        [tp_params["ent_b"],
         tp_params["head_rel_b"].reshape(R * 3),
         tp_params["tail_rel_b"].reshape(R * 3)], axis=0)
    if mirror_bf16:
        x = last_hidden.astype(jnp.bfloat16)
        A = (jnp.einsum("bsh,hk->bsk", x, waT.astype(jnp.bfloat16),
                        preferred_element_type=jnp.float32) + cb).astype(jnp.bfloat16)
        Bm = jnp.einsum("bsh,hk->bsk", x, wbT.astype(jnp.bfloat16),
                        preferred_element_type=jnp.float32).astype(jnp.bfloat16)
        sh = jnp.tanh(A[:, i_idx, :] + Bm[:, j_idx, :])             # bf16 add + tanh
        logits = (jnp.einsum("blh,hk->blk", sh, w_heads.T.astype(jnp.bfloat16),
                             preferred_element_type=jnp.float32) + b_heads)
        logits = logits.astype(jnp.bfloat16).astype(jnp.float32)    # bf16 store
    else:
        rep = last_hidden[:, i_idx, :]
        vis = last_hidden[:, j_idx, :]
        sh = jnp.tanh(rep @ waT + vis @ wbT + cb)
        logits = sh @ w_heads.T + b_heads
    return logits                                                   # (B, L, K)


if __name__ == "__main__":
    B, S, H = 2, 8, 32
    VOCAB, MAX_POS = 50, 16
    REL_SIZE = 3

    root = jax.random.PRNGKey(0)
    k_enc, k_tp, k_ids = jax.random.split(root, 3)

    enc_params = init_encoder_params(k_enc, VOCAB, MAX_POS, H)
    tp_params = init_tplinker_params(k_tp, H, REL_SIZE)

    input_ids = jax.random.randint(k_ids, (B, S), 0, VOCAB, dtype=jnp.int32)
    attention_mask = jnp.ones((B, S), dtype=jnp.int32)
    token_type_ids = jnp.zeros((B, S), dtype=jnp.int32)

    ent, head_rel, tail_rel = tplinker_bert_forward(
        enc_params, tp_params, REL_SIZE, input_ids, attention_mask, token_type_ids)
    jax.block_until_ready((ent, head_rel, tail_rel))

    # shape checks
    L = S * (S + 1) // 2
    assert ent.shape == (B, L, 2)
    assert head_rel.shape == (B, REL_SIZE, L, 3)
    assert tail_rel.shape == (B, REL_SIZE, L, 3)

    # numeric checks (all K columns: ent + head_rel + tail_rel)
    last_hidden = encoder_forward(enc_params, input_ids, attention_mask, token_type_ids)
    i_idx, j_idx = _pair_indices(S)

    # (a) check against a reference mirroring the kernel's bf16 casts
    ref = reference_pair_logits(last_hidden, tp_params, REL_SIZE, i_idx, j_idx,
                                mirror_bf16=True)
    ref_ent = ref[:, :, :2]
    ref_head = jnp.transpose(ref[:, :, 2:2 + 3 * REL_SIZE].reshape(B, L, REL_SIZE, 3),
                             (0, 2, 1, 3))
    ref_tail = jnp.transpose(ref[:, :, 2 + 3 * REL_SIZE:].reshape(B, L, REL_SIZE, 3),
                             (0, 2, 1, 3))
    assert jnp.allclose(ent, ref_ent, atol=5e-2, rtol=5e-2)
    assert jnp.allclose(head_rel, ref_head, atol=5e-2, rtol=5e-2)
    assert jnp.allclose(tail_rel, ref_tail, atol=5e-2, rtol=5e-2)

    # (b) loose semantic check against the full-f32 math (bf16 tolerance)
    ref32 = reference_pair_logits(last_hidden, tp_params, REL_SIZE, i_idx, j_idx,
                                  mirror_bf16=False)
    assert jnp.allclose(ent, ref32[:, :, :2], atol=0.15, rtol=0.15)

    print("KERNEL_OK")
</pallas_src>

<mosaic_0001>
module attributes {stable_mosaic.version = 11 : i64} {
  func.func @_project_kernel(%arg0: i32, %arg1: memref<1x8x32xbf16, #tpu.memory_space<vmem>>, %arg2: memref<32x64xbf16, #tpu.memory_space<vmem>>, %arg3: memref<1x32xf32, #tpu.memory_space<vmem>>, %arg4: memref<1x8x32xbf16, #tpu.memory_space<vmem>>, %arg5: memref<1x8x32xbf16, #tpu.memory_space<vmem>>) attributes {dimension_semantics = [#tpu.dimension_semantics<parallel>], iteration_bounds = array<i64: 2>, scalar_prefetch = 0 : i64, scratch_operands = 0 : i64, tpu.core_type = #tpu.core_type<tc>, window_params = [{transform_indices = @transform_0, window_bounds = array<i64: 1, 8, 32>}, {pipeline_mode = #tpu.pipeline_mode<synchronous>, transform_indices = @transform_1, window_bounds = array<i64: 32, 64>}, {pipeline_mode = #tpu.pipeline_mode<synchronous>, transform_indices = @transform_2, window_bounds = array<i64: 1, 32>}, {transform_indices = @transform_3, window_bounds = array<i64: 1, 8, 32>}, {transform_indices = @transform_4, window_bounds = array<i64: 1, 8, 32>}]} {
    %c0 = arith.constant 0 : index
    %c0_0 = arith.constant 0 : index
    %c0_1 = arith.constant 0 : index
    %0 = vector.load %arg1[%c0, %c0_0, %c0_1] : memref<1x8x32xbf16, #tpu.memory_space<vmem>>, vector<1x8x32xbf16>
    %1 = vector.shape_cast %0 : vector<1x8x32xbf16> to vector<8x32xbf16>
    %c0_2 = arith.constant 0 : index
    %c0_3 = arith.constant 0 : index
    %2 = vector.load %arg2[%c0_2, %c0_3] : memref<32x64xbf16, #tpu.memory_space<vmem>>, vector<32x64xbf16>
    %cst = arith.constant dense<0.000000e+00> : vector<8x64xf32>
    %3 = tpu.matmul %1, %2, %cst {dimension_numbers = #tpu.dot_dimension_numbers<[1], [0], [0], [1], [0, 0, 1, 1], [], []>} : vector<8x32xbf16>, vector<32x64xbf16>, vector<8x64xf32> -> vector<8x64xf32>
    %4 = vector.extract_strided_slice %3 {offsets = [0, 0], sizes = [8, 32], strides = [1, 1]} : vector<8x64xf32> to vector<8x32xf32>
    %c0_4 = arith.constant 0 : index
    %c0_5 = arith.constant 0 : index
    %5 = vector.load %arg3[%c0_4, %c0_5] : memref<1x32xf32, #tpu.memory_space<vmem>>, vector<1x32xf32>
    %6 = vector.broadcast %5 : vector<1x32xf32> to vector<8x32xf32>
    %7 = arith.addf %4, %6 : vector<8x32xf32>
    %8 = arith.truncf %7 : vector<8x32xf32> to vector<8x32xbf16>
    %c0_6 = arith.constant 0 : index
    %c0_7 = arith.constant 0 : index
    %c0_8 = arith.constant 0 : index
    %9 = vector.load %arg4[%c0_6, %c0_7, %c0_8] : memref<1x8x32xbf16, #tpu.memory_space<vmem>>, vector<1x8x32xbf16>
    %10 = vector.shape_cast %9 : vector<1x8x32xbf16> to vector<8x32xbf16>
    %11 = vector.shape_cast %8 : vector<8x32xbf16> to vector<1x8x32xbf16>
    tpu.vector_store %arg4[%c0_6, %c0_7, %c0_8], %11 {strides = array<i32>} : memref<1x8x32xbf16, #tpu.memory_space<vmem>>, vector<1x8x32xbf16>,
    %12 = vector.extract_strided_slice %3 {offsets = [0, 32], sizes = [8, 32], strides = [1, 1]} : vector<8x64xf32> to vector<8x32xf32>
    %13 = arith.truncf %12 : vector<8x32xf32> to vector<8x32xbf16>
    %c0_9 = arith.constant 0 : index
    %c0_10 = arith.constant 0 : index
    %c0_11 = arith.constant 0 : index
    %14 = vector.load %arg5[%c0_9, %c0_10, %c0_11] : memref<1x8x32xbf16, #tpu.memory_space<vmem>>, vector<1x8x32xbf16>
    %15 = vector.shape_cast %14 : vector<1x8x32xbf16> to vector<8x32xbf16>
    %16 = vector.shape_cast %13 : vector<8x32xbf16> to vector<1x8x32xbf16>
    tpu.vector_store %arg5[%c0_9, %c0_10, %c0_11], %16 {strides = array<i32>} : memref<1x8x32xbf16, #tpu.memory_space<vmem>>, vector<1x8x32xbf16>,
    return
  }
  func.func @transform_0(%arg0: i32) -> (i32, i32, i32) {
    %c0_i32 = arith.constant 0 : i32
    %c0_i32_0 = arith.constant 0 : i32
    %c0_i32_1 = arith.constant 0 : i32
    return %arg0, %c0_i32, %c0_i32_0 : i32, i32, i32
  }
  func.func @transform_1(%arg0: i32) -> (i32, i32) {
    %c0_i32 = arith.constant 0 : i32
    %c0_i32_0 = arith.constant 0 : i32
    %c0_i32_1 = arith.constant 0 : i32
    return %c0_i32, %c0_i32_0 : i32, i32
  }
  func.func @transform_2(%arg0: i32) -> (i32, i32) {
    %c0_i32 = arith.constant 0 : i32
    %c0_i32_0 = arith.constant 0 : i32
    %c0_i32_1 = arith.constant 0 : i32
    return %c0_i32, %c0_i32_0 : i32, i32
  }
  func.func @transform_3(%arg0: i32) -> (i32, i32, i32) {
    %c0_i32 = arith.constant 0 : i32
    %c0_i32_0 = arith.constant 0 : i32
    %c0_i32_1 = arith.constant 0 : i32
    return %arg0, %c0_i32, %c0_i32_0 : i32, i32, i32
  }
  func.func @transform_4(%arg0: i32) -> (i32, i32, i32) {
    %c0_i32 = arith.constant 0 : i32
    %c0_i32_0 = arith.constant 0 : i32
    %c0_i32_1 = arith.constant 0 : i32
    return %arg0, %c0_i32, %c0_i32_0 : i32, i32, i32
  }
}

</mosaic_0001>

<bundles_post_ra>
// kernel: tpu_custom_call.1
= control target key start
LH: loop header
LB: loop body
LE: loop exit
PB: predicated region body
PF: predicated region fallthrough
CT: control target
= control target key end

     0   :  { %10 = vsyncpa [#allocation3], 0  ;;  %s957_s0 = inlined_call_operand.hbm [shape: bf16[2,8,32], index: 0, kind: input, shape index: {}]   ;;  %s958_s1 = inlined_call_operand.hbm [shape: bf16[32,64], index: 1, kind: input, shape index: {}]   ;;  %s959_s2 = inlined_call_operand.vmem [shape: f32[1,32], index: 2, kind: input, shape index: {}]   ;;  %s960_s3 = inlined_call_operand.hbm [shape: bf16[2,8,32], index: 3, kind: output, shape index: {0}]   ;;  %s961_s4 = inlined_call_operand.hbm [shape: bf16[2,8,32], index: 4, kind: output, shape index: {1}]  }
   0x1   :  { %12 = vsyncpa [#allocation3 + $0x1], 0 }
   0x2   :  { %13 = vsyncpa [#allocation6], 0 }
   0x3   :  { %14 = vsyncpa [#allocation4], 0 }
   0x4   :  { %16 = vsyncpa [#allocation4 + $0x1], 0 }
   0x5   :  { %17 = vsyncpa [#allocation9], 0 }
   0x6   :  { %19 = vsyncpa [#allocation9 + $0x1], 0  ;;  %s755_s15 = smov 0   ;;  %s757_s16 = smov 0  }
   0x7   :  { %s759_s17 = smov 0   ;;  %s761_s18 = smov 0  }
   0x8 LB: > { %s776_s19 = sadd.s32 4294967295, %s719_s18   ;;  %s464_s20 = sadd.s32 4294967294, %s719_s18   ;;  %s719_s18 = sphi %s761_s18, %s983_s18   ;;  %s715_s17 = sphi %s759_s17, %s982_s17   ;;  %s711_s16 = sphi %s757_s16, %s981_s16   ;;  %s707_s15 = sphi %s755_s15, %s980_s15  }
   0x9   : > { %p45_p0 = scmp.ne.s32.totalorder %s711_s16, %s707_s15  ;;  %p962_p1 = scmp.eq.s32.totalorder %s776_s19, 0 }
   0xa   : > { %p117_p3 = scmp.eq.s32.totalorder %s464_s20, 1  ;;  %p465_p5 = scmp.ge.s32.totalorder %s719_s18, 1 }
   0xb   : > { %p785_p4 = por %p962_p1, %p45_p0  ;;  %p150_p7 = scmp.lt.s32.totalorder %s719_s18, 3 }
   0xc   : > { %p790_p6 = por %p117_p3, %p45_p0  ;;  %s721_s24 = smov [#allocation5]  }
   0xd   : > { %s966_s21 = scalar_select %p785_p4, 1, 0 }
   0xe   : > { %s967_s22 = scalar_select %p790_p6, 1, 0 }
   0xf   : > { %p795_p8 = pnand %p465_p5, %p150_p7  ;;  %s162_s25 = sshll.u32 %s721_s24, 4  ;;  %s163_s25 = int_to_ptr.vmem [resolvable:$true] %s162_s25 }
  0x10   : > { %s809_s27 = sadd.s32 1, %s719_s18   ;;  %s32_s28 = sadd.s32 1, %s715_s17 }
  0x11   : > { %s968_s23 = scalar_select %p795_p8, 1, 0 }
  0x12   : > { %p508_p9 = pneg %p795_p8  ;;  %s29_s29 = ssub.s32 %s719_s18, %s809_s27 }
  0x13   : > { %s578_s30 = scalar_lea.vmem %s163_s25, 256  ;;  %p586_p5 = scmp.lt.s32.totalorder %s163_s25, %s163_s25 }
  0x14   : > { %p804_p11 = pnand %p508_p9, %p962_p1  ;;  %p579_p13 = scmp.ne.s32.totalorder %s163_s25, %s578_s30 }
  0x15   : > { %p587_p7 = scmp.lt.s32.totalorder %s578_s30, %s578_s30 }
  0x16   : > { %p569_p12 = pneg %p804_p11 }
  0x17   : > { %p588_p10 = por %p587_p7, %p586_p5 }
  0x18   : > { %p581_p0 = pnand %p579_p13, %p569_p12 }
  0x1a   : > { %p582_p3 = pneg %p581_p0 }
  0x1c   : > { %p589_p2 = pnand %p588_p10, %p582_p3 }
  0x1e   : > { %592 = shalt.err (!%p589_p2)
}
  0x1f   : > { %s722_s5 = smov 64   ;;  %s723_s6 = smov 4  }
  0x20   : > { %511 = dma.hbm_to_vmem [thread:$0]  (!%p804_p11), %s958_s1, 256, %s163_s25, [#allocation6], %s722_s5, %s722_s5, %s723_s6  }
  0x21   : > { %p30_p9 = scmp.eq.s32.totalorder %s29_s29, 0  ;;  %p39_p12 = scmp.ne.s32.totalorder %s715_s17, %s711_s16 }
  0x22   : > { %p40_p10 = scmp.eq.s32.totalorder %s719_s18, 0  ;;  %p524_p2 = scmp.lt.s32.totalorder %s719_s18, 2 }
  0x23   : > { %s826_s9 = scalar_select %p30_p9, %s715_s17, %s32_s28  }
  0x24   : > { %p41_p13 = por %p40_p10, %p39_p12  ;;  %p970_p0 = scmp.eq.s32.totalorder %s776_s19, 1 }
  0x25   : > { %s179_s11 = sand.u32 1, %s715_s17   ;;  %s469_s12 = sshll.u32 %s719_s18, 6 }
  0x26   : > { %p830_p3 = por %p970_p0, %p39_p12  ;;  %s468_s13 = sshll.u32 %s179_s11, 2 }
  0x27   : > { %s839_s24 = scalar_lea.hbm %s957_s0, %s469_s12  ;;  %s183_s25 = scalar_lea.vmem [#allocation2], %s468_s13 }
  0x28   : > { %s971_s10 = scalar_select %p830_p3, 1, 0 }
  0x29   : > { %s190_s26 = sshll.u32 %s183_s25, 4  ;;  %p841_p11 = pnand %p524_p2, %p41_p13  ;;  %s191_s26 = int_to_ptr.vmem [resolvable:$true] %s190_s26 }
  0x2a   : > { %s180_s29 = scalar_lea.sflag [#allocation3], %s179_s11  ;;  %s593_s30 = scalar_lea.hbm %s839_s24, 64 }
  0x2b   : > { %p594_p5 = scmp.ne.s32.totalorder %s839_s24, %s593_s30  ;;  %p595_p7 = pneg %p841_p11 }
  0x2c   : > { %s598_s7 = scalar_lea.hbm %s957_s0, 128  ;;  %p599_p10 = scmp.lt.s32.totalorder %s839_s24, %s957_s0 }
  0x2d   : > { %p596_p9 = pnand %p595_p7, %p594_p5  ;;  %p600_p2 = scmp.lt.s32.totalorder %s598_s7, %s593_s30 }
  0x2f   : > { %p597_p12 = pneg %p596_p9  ;;  %p601_p13 = por %p600_p2, %p599_p10 }
  0x31   : > { %p602_p0 = pnand %p601_p13, %p597_p12 }
  0x33   : > { %605 = shalt.err (!%p602_p0)
}
  0x34   : > { %s606_s13 = scalar_lea.vmem %s191_s26, 64  ;;  %s724_s11 = smov [#allocation2]  }
  0x35   : > { %p607_p1 = scmp.ne.s32.totalorder %s191_s26, %s606_s13  ;;  %s611_s14 = sshll.u32 %s724_s11, 4  ;;  %s612_s14 = int_to_ptr.vmem [resolvable:$false] %s611_s14 }
  0x36   : > { %s613_s20 = scalar_lea.vmem %s612_s14, 128  ;;  %p614_p5 = scmp.lt.s32.totalorder %s191_s26, %s612_s14 }
  0x37   : > { %p609_p6 = pnand %p607_p1, %p595_p7  ;;  %p615_p9 = scmp.lt.s32.totalorder %s613_s20, %s606_s13 }
  0x39   : > { %p610_p3 = pneg %p609_p6  ;;  %p616_p4 = por %p615_p9, %p614_p5 }
  0x3b   : > { %p617_p8 = pnand %p616_p4, %p610_p3 }
  0x3d   : > { %620 = shalt.err (!%p617_p8)
}
  0x3e   : > { %515 = dma.hbm_to_vmem [thread:$0]  (!%p841_p11), %s839_s24, 64, %s191_s26, %s180_s29  }
  0x3f   : > { %p973_p12 = scmp.ne.s32.totalorder %s968_s23, 0 }
  0x40   : > { %s862_s25 = sand.u32 (!%p973_p12), 1, %s711_s16   ;;  %p974_p1 = scmp.ne.s32.totalorder (!%p973_p12), %s966_s21, 0 }
  0x41   : > { %199 = sbr.rel (%p973_p12) target bundleno = 406 (0x196), region = 32  ;;  %s865_s30 = sshll.u32 (!%p973_p12), %s862_s25, 2 }
  0x42   : > { %s202_s5 = scalar_lea.sflag (!%p973_p12), [#allocation3], %s862_s25  ;;  %s205_s6 = scalar_lea.vmem (!%p973_p12), [#allocation2], %s865_s30 }
  0x46   : > { %690 = dma.done.wait (%p974_p1), %s202_s5, 64  }
  0x47   : > { %692 = vsyncadd (%p974_p1), %s202_s5, 4294967232  ;;  %p975_p4 = scmp.eq.s32.totalorder %s776_s19, 0 }
  0x49   : > { %694 = dma.done.wait (%p975_p4), [#allocation6], 256   ;;  %p976_p6 = pmov %p975_p4 }
  0x4a   : > { %v725_v0 = vmov 0.0   ;;  %vm726_vm0 = vmmov 0   ;;  %v565_v1 = vld [vmem:[#allocation5 + $0x8] sm:$0xff]   ;;  %v566_v2 = vld [vmem:[#allocation5] sm:$0xff]   ;;  %v240_v3 = vld [vmem:[%s205_s6] sm:$0xf] }
  0x4b   : > { %696 = vsyncadd (%p976_p6), [#allocation6], 4294967040  ;;  %490 = vmatprep.subr.bf16.mxu0 %v725_v0  ;;  %494 = vmatprep.mubr.msk.bf16.mxu0 %vm726_vm0, %v725_v0  ;;  %vm257_vm1 = vcmask 261120   ;;  %v478_v4 = vld [vmem:[%s959_s2] ss:$0 sm:$0xff]  ;;  %s482_s24 = sshll.u32 %s776_s19, 6 }
  0x4c   : > { %491 = vmatpush3.bf16.msra.mxu0 %v565_v1  ;;  %s231_s26 = scalar_lea.vmem [#allocation7], %s865_s30  ;;  %vm310_vm2 = vcmask 257024   ;;  %s727_s29 = smov 96  }
  0x4d   : > { %492 = vmatprep.subr.bf16.mxu0 %v725_v0  ;;  %s339_s28 = sshll.u32 %s231_s26, 4  ;;  %s887_s12 = scalar_lea.hbm %s960_s3, %s482_s24  ;;  %s889_s28 = int_to_ptr.vmem [resolvable:$true] %s339_s28 }
  0x4e   : > { %s321_s13 = scalar_lea.sflag [#allocation4], %s862_s25  ;;  %s621_s11 = scalar_lea.vmem %s889_s28, 64 }
  0x4f   : > { %p622_p8 = scmp.ne.s32.totalorder %s889_s28, %s621_s11  ;;  %p977_p3 = scmp.ne.s32.totalorder %s971_s10, 0 }
  0x50   : > { %493 = vmatpush3.bf16.msra.mxu0 %v566_v2  ;;  %s728_s14 = smov [#allocation7]  }
  0x51   : > { %p623_p11 = pnand %p622_p8, %p977_p3  ;;  %s625_s20 = sshll.u32 %s728_s14, 4  ;;  %s626_s20 = int_to_ptr.vmem [resolvable:$false] %s625_s20 }
  0x52   : > { %s627_s5 = scalar_lea.vmem %s626_s20, 128  ;;  %p628_p10 = scmp.lt.s32.totalorder %s889_s28, %s626_s20 }
  0x53   : > { %495 = vmatmul.mubr.msk.bf16.vlgmr.msra.gmra.mxu0 %vm257_vm1, %v240_v3  ;;  %p624_p7 = pneg %p623_p11  ;;  %p629_p2 = scmp.lt.s32.totalorder %s627_s5, %s621_s11 }
  0x55   : > { %p630_p13 = por %p629_p2, %p628_p10 }
  0x57   : > { %p631_p0 = pnand %p630_p13, %p624_p7 }
 0x113   : > { %v295_v5 = vpop.f32.mrf.mxu0 }
 0x114   : > { %v308_v6 = vadd.f32 %v478_v4, %v295_v5  ;;  %v486_v7 = vpack.c.bf16 %v295_v5, %v295_v5 }
 0x115   : > { %v496_v8 = vpop.f32.mrf.mxu0 }
 0x116   : > { %v309_v9 = vpack.c.bf16 %v308_v6, %v308_v6  ;;  %316 = vrot.lane.b32.xlu0 %v486_v7, %s727_s29 }
 0x117   : > { %v298_v10 = vpop.f32.mrf.mxu0 }
 0x118   : > { %311 = vst.msk [vmem:[%s231_s26] sm:$0xf] %vm310_vm2, %v309_v9 }
 0x119   : > { %v497_v11 = vpop.f32.mrf.mxu0 }
 0x11a   : > { %634 = shalt.err (!%p631_p0)
}
 0x11b   : > { %s635_s6 = scalar_lea.hbm %s887_s12, 64  ;;  %s639_s26 = scalar_lea.hbm %s960_s3, 128 }
 0x11c   : > { %p636_p5 = scmp.ne.s32.totalorder %s887_s12, %s635_s6  ;;  %p640_p1 = scmp.lt.s32.totalorder %s887_s12, %s960_s3 }
 0x11d   : > { %p641_p4 = scmp.lt.s32.totalorder %s639_s26, %s635_s6 }
 0x11e   : > { %p637_p9 = pnand %p636_p5, %p977_p3 }
 0x11f   : > { %p642_p6 = por %p641_p4, %p640_p1 }
 0x120   : > { %p638_p12 = pneg %p637_p9 }
 0x122   : > { %p643_p8 = pnand %p642_p6, %p638_p12 }
 0x124   : > { %646 = shalt.err (!%p643_p8)
}
 0x125   : > { %504 = dma.vmem_to_hbm [thread:$0]  (%p977_p3), %s889_s28, 64, %s887_s12, %s321_s13  }
 0x126   : > { %s238_s8 = scalar_lea.vmem [#allocation8], %s865_s30  ;;  %s919_s5 = scalar_lea.hbm %s961_s4, %s482_s24 }
 0x127   : > { %s352_s11 = sshll.u32 %s238_s8, 4  ;;  %s326_s6 = scalar_lea.sflag [#allocation9], %s862_s25  ;;  %s353_s11 = int_to_ptr.vmem [resolvable:$true] %s352_s11 }
 0x128   : > { %s647_s21 = scalar_lea.vmem %s353_s11, 64  ;;  %s729_s23 = smov [#allocation8]  }
 0x129   : > { %p648_p11 = scmp.ne.s32.totalorder %s353_s11, %s647_s21  ;;  %s651_s28 = sshll.u32 %s729_s23, 4  ;;  %s652_s28 = int_to_ptr.vmem [resolvable:$false] %s651_s28 }
 0x12a   : > { %s653_s30 = scalar_lea.vmem %s652_s28, 128  ;;  %p654_p2 = scmp.lt.s32.totalorder %s353_s11, %s652_s28 }
 0x12b   : > { %p649_p7 = pnand %p648_p11, %p977_p3  ;;  %p655_p13 = scmp.lt.s32.totalorder %s653_s30, %s647_s21 }
 0x12d   : > { %p650_p10 = pneg %p649_p7  ;;  %p656_p0 = por %p655_p13, %p654_p2 }
 0x12f   : > { %p657_p5 = pnand %p656_p0, %p650_p10 }
 0x188   : > { %v317_v12 = vpop.permute.xlu0 %316 }
 0x189   : > { %319 = vst.msk [vmem:[%s238_s8] sm:$0xf] %vm310_vm2, %v317_v12 }
 0x18a   : > { %660 = shalt.err (!%p657_p5)
}
 0x18b   : > { %s661_s19 = scalar_lea.hbm %s919_s5, 64  ;;  %s665_s12 = scalar_lea.hbm %s961_s4, 128 }
 0x18c   : > { %p662_p9 = scmp.ne.s32.totalorder %s919_s5, %s661_s19  ;;  %p666_p4 = scmp.lt.s32.totalorder %s919_s5, %s961_s4 }
 0x18d   : > { %p667_p6 = scmp.lt.s32.totalorder %s665_s12, %s661_s19 }
 0x18e   : > { %p663_p12 = pnand %p662_p9, %p977_p3 }
 0x18f   : > { %p668_p8 = por %p667_p6, %p666_p4 }
 0x190   : > { %p664_p1 = pneg %p663_p12 }
 0x192   : > { %p669_p11 = pnand %p668_p8, %p664_p1 }
 0x194   : > { %672 = shalt.err (!%p669_p11)
}
 0x195   : > { %505 = dma.vmem_to_hbm [thread:$0]  (%p977_p3), %s353_s11, 64, %s919_s5, %s326_s6  }
 0x196 PF: > { %s364_s29 = sand.u32 1, %s707_s15   ;;  %p978_p7 = scmp.ne.s32.totalorder %s967_s22, 0 }
 0x197   : > { %p979_p10 = scmp.ge.s32.totalorder %s719_s18, 2  ;;  %s365_s7 = scalar_lea.sflag [#allocation4], %s364_s29 }
 0x199   : > { %p517_p2 = pnand %p979_p10, %p978_p7 }
 0x19b   : > { %p518_p13 = pneg %p517_p2 }
 0x19d   : > { %698 = dma.done.wait (%p518_p13), %s365_s7, 64  }
 0x19e   : > { %700 = vsyncadd (%p518_p13), %s365_s7, 4294967232  ;;  %s374_s8 = scalar_lea.sflag [#allocation9], %s364_s29 }
 0x19f   : > { %702 = dma.done.wait (%p518_p13), %s374_s8, 64  }
 0x1a0   : > { %704 = vsyncadd (%p518_p13), %s374_s8, 4294967232  ;;  %p22_p3 = scmp.ge.s32.totalorder %s809_s27, 4   ;;  %s980_s15 = smov %s711_s16 }
 0x1a1   : > { %s981_s16 = smov %s715_s17  ;;  %s982_s17 = smov %s826_s9 }
 0x1a2   : > { %s983_s18 = smov %s809_s27  ;;  %24 = sbr.rel (!%p22_p3) target bundleno = 8 (0x8), region = 98 }
 0x1a7   :  { %379 = vsyncpa [#allocation3], 1 }
 0x1a8   :  { %381 = vsyncpa [#allocation3 + $0x1], 1 }
 0x1a9   :  { %382 = vsyncpa [#allocation6], 1 }
 0x1aa   :  { %383 = vsyncpa [#allocation4], 1 }
 0x1ab   :  { %385 = vsyncpa [#allocation4 + $0x1], 1 }
 0x1ac   :  { %386 = vsyncpa [#allocation9], 1 }
 0x1ad   :  { %388 = vsyncpa [#allocation9 + $0x1], 1 }

</bundles_post_ra>
